<compile_context>
chip_gen: v5e
topology: v5e:2x2
jax: 0.10.0
libtpu: 0.0.40
codegen_flags: <defaults>
</compile_context>

<pallas_src>
import functools

import jax
import jax.numpy as jnp
from jax import lax
from jax.experimental import pallas as pl
from jax.experimental.pallas import tpu as pltpu

rep_layers = [0, 3, 7, 3]
sc_ch_dict = {0.2: [16, 16, 32, 64, 128, 1024], 0.5: [24, 24, 48, 96, 192, 1024],
              0.75: [24, 24, 86, 172, 344, 1024], 1.0: [24, 24, 116, 232, 464, 1024],
              1.25: [24, 24, 144, 288, 576, 1024], 1.5: [24, 24, 176, 352, 704, 1024],
              1.75: [24, 24, 210, 420, 840, 1024], 2.0: [24, 24, 244, 488, 976, 1024],
              2.4: [24, 24, 278, 556, 1112, 1280]}

BN_EPS = 1e-5
LANE = 128


# ------------------------------ Pallas kernel -------------------------------

def _fused_cbr_maxpool_kernel(A, B, ipb, p_ref, w_ref, a_ref, o_ref):
    """One block of `ipb` images: conv-as-matmul (BN scale+bias folded) ->
    PReLU -> 3x3/s2/p1 maxpool.

    p_ref : (1, ipb*4*A*B, Kp) bf16  im2col rows ordered (img, phase=(h%2,w%2), a, b);
                                      column K holds 1.0 (BN bias), rest of pad is 0.
    w_ref : (Kp, Cp) bf16            conv weight * BN scale; row K = BN bias; zero padded.
    a_ref : (1, Cp)  f32             PReLU alpha (zero padded channels).
    o_ref : (1, ipb*A*B, Cp) f32     pooled output, lane-dense in channels.
    """
    AB = A * B
    x = p_ref[0]                                                       # (ipb*4AB, Kp) bf16
    y = jnp.dot(x, w_ref[...], preferred_element_type=jnp.float32)     # (ipb*4AB, Cp) f32
    alpha = a_ref[...]                                                 # (1, Cp)
    y = jnp.where(y >= 0.0, y, alpha * y)                              # PReLU

    neg = jnp.float32(-jnp.inf)
    row = lax.broadcasted_iota(jnp.int32, (AB, 1), 0)   # flattened (a, b) index

    def shift_b(t):          # t[a, b] -> t[a, b-1]; -inf where b == 0 (left pad)
        return jnp.where(row % B == 0, neg, pltpu.roll(t, shift=1, axis=0))

    def shift_a(t):          # t[a, b] -> t[a-1, b]; -inf where a == 0 (top pad)
        return jnp.where(row < B, neg, pltpu.roll(t, shift=B, axis=0))

    for m in range(ipb):                                 # static unroll over images in block
        base = m * 4 * AB
        # Phase slabs: e_pq[a*B + b, c] == conv[h=2a+p, w=2b+q, c]
        e00 = y[base + 0 * AB: base + 1 * AB]
        e01 = y[base + 1 * AB: base + 2 * AB]
        e10 = y[base + 2 * AB: base + 3 * AB]
        e11 = y[base + 3 * AB: base + 4 * AB]
        # max over w in {2j-1, 2j, 2j+1} for input rows h=2i (r0) and h=2i+1 (r1)
        r0 = jnp.maximum(jnp.maximum(e00, e01), shift_b(e01))
        r1 = jnp.maximum(jnp.maximum(e10, e11), shift_b(e11))
        # max over h in {2i-1, 2i, 2i+1}
        pooled = jnp.maximum(jnp.maximum(r0, r1), shift_a(r1))         # (AB, Cp)
        o_ref[0, pl.ds(m * AB, AB), :] = pooled                        # lane-dense store


def fused_cbr_maxpool(patches, w_pad, alpha, A, B, ipb):
    nblk, Mblk, Kp = patches.shape
    Cp = w_pad.shape[1]
    AB = A * B
    kernel = functools.partial(_fused_cbr_maxpool_kernel, A, B, ipb)
    return pl.pallas_call(
        kernel,
        out_shape=jax.ShapeDtypeStruct((nblk, ipb * AB, Cp), jnp.float32),
        grid_spec=pltpu.PrefetchScalarGridSpec(
            num_scalar_prefetch=0,
            grid=(nblk,),
            in_specs=[
                pl.BlockSpec((1, Mblk, Kp), lambda g: (g, 0, 0)),
                pl.BlockSpec((Kp, Cp), lambda g: (0, 0)),
                pl.BlockSpec((1, Cp), lambda g: (0, 0)),
            ],
            out_specs=pl.BlockSpec((1, ipb * AB, Cp), lambda g: (g, 0, 0)),
        ),
        compiler_params=pltpu.CompilerParams(dimension_semantics=("parallel",)),
    )(patches, w_pad, alpha)


# ------------------------------ JAX glue -------------------------------------

def im2col_3x3_s2p1_phase(x_nchw, Kp):
    """3x3, stride 2, pad 1 patches; rows ordered (phase=(h%2, w%2), a, b).
    K ordered (Cin, ky, kx) to match torch weight.reshape(Cout, Cin*9).
    Column K is set to 1.0 so the BN bias can live in the matmul."""
    N, C, H, W = x_nchw.shape
    Ho, Wo = H // 2, W // 2
    A, B = Ho // 2, Wo // 2
    K = C * 9
    xp = jnp.pad(x_nchw, ((0, 0), (0, 0), (1, 1), (1, 1)))
    cols = [xp[:, :, ky:ky + 2 * Ho:2, kx:kx + 2 * Wo:2]
            for ky in range(3) for kx in range(3)]
    p = jnp.stack(cols, axis=2)                 # (N, C, 9, Ho, Wo)
    p = p.transpose(0, 3, 4, 1, 2)              # (N, Ho, Wo, C, 9)
    p = p.reshape(N, A, 2, B, 2, K)             # h = 2a + ph, w = 2b + pw
    p = p.transpose(0, 2, 4, 1, 3, 5)           # (N, ph, pw, A, B, K)
    p = p.reshape(N, 4 * A * B, K)
    ones = jnp.ones((N, 4 * A * B, 1), p.dtype)            # bias column
    p = jnp.concatenate([p, ones], axis=-1)                # (N, 4AB, K+1)
    if Kp > K + 1:
        p = jnp.pad(p, ((0, 0), (0, 0), (0, Kp - K - 1)))
    return p


@jax.jit
def cnn_model_forward(x_nchw, params):
    N, Cin, H, W = x_nchw.shape
    assert H % 32 == 0 and W % 32 == 0, "Input image width/height must be divisible by 32"
    Ho, Wo = H // 2, W // 2
    A, B = Ho // 2, Wo // 2                       # pooled spatial dims

    w = params["conv_w"]                          # (Cout, Cin, 3, 3)
    Cout = w.shape[0]
    K = Cin * 9
    Kp = ((K + 1 + 7) // 8) * 8                   # contraction dim incl. bias column
    Cp = ((Cout + LANE - 1) // LANE) * LANE       # lane-dense channel dim

    # Fold BN (inference) into the conv weight; bias becomes an extra matmul row.
    scale = params["bn_gamma"] / jnp.sqrt(params["bn_var"] + BN_EPS)        # (Cout,)
    bias = params["bn_beta"] - params["bn_mean"] * scale
    w_kc = w.reshape(Cout, K).T * scale[None, :]                            # (K, Cout)
    w_aug = jnp.concatenate([w_kc, bias[None, :]], axis=0)                  # (K+1, Cout)
    w_pad = jnp.pad(w_aug, ((0, Kp - (K + 1)), (0, Cp - Cout))).astype(jnp.bfloat16)

    # PReLU alpha: torch nn.PReLU() default is a single shared scalar -> broadcast.
    alpha = jnp.broadcast_to(params["prelu_a"], (Cout,))
    alpha = jnp.pad(alpha, (0, Cp - Cout)).reshape(1, Cp).astype(jnp.float32)

    # Fold batch into the matmul M dim, but keep >= 2 grid blocks for v7x's 2 TCs.
    nblk = 2 if (N >= 2 and N % 2 == 0) else 1
    ipb = N // nblk
    patches = im2col_3x3_s2p1_phase(x_nchw, Kp)                 # (N, 4AB, Kp) f32
    patches = patches.reshape(nblk, ipb * 4 * A * B, Kp).astype(jnp.bfloat16)

    out = fused_cbr_maxpool(patches, w_pad, alpha, A, B, ipb)   # (nblk, ipb*AB, Cp)
    out = out.reshape(N, A, B, Cp)[:, :, :, :Cout]              # tiny channel slice
    return out.transpose(0, 3, 1, 2)                            # NCHW


# ------------------------------ pure-JAX reference ---------------------------

def reference_forward(x_nchw, params):
    w = params["conv_w"]
    Cout = w.shape[0]
    y = lax.conv_general_dilated(
        x_nchw, w, window_strides=(2, 2), padding=((1, 1), (1, 1)),
        dimension_numbers=("NCHW", "OIHW", "NCHW"),
        precision=lax.Precision.HIGHEST)
    scale = (params["bn_gamma"] / jnp.sqrt(params["bn_var"] + BN_EPS)).reshape(1, Cout, 1, 1)
    bias = (params["bn_beta"] - params["bn_mean"] *
            (params["bn_gamma"] / jnp.sqrt(params["bn_var"] + BN_EPS))).reshape(1, Cout, 1, 1)
    y = y * scale + bias
    a = jnp.broadcast_to(params["prelu_a"], (Cout,)).reshape(1, Cout, 1, 1)
    y = jnp.where(y >= 0.0, y, a * y)
    z = lax.reduce_window(y, -jnp.inf, lax.max,
                          window_dimensions=(1, 1, 3, 3),
                          window_strides=(1, 1, 2, 2),
                          padding=((0, 0), (0, 0), (1, 1), (1, 1)))
    return z


# ------------------------------ main ----------------------------------------

if __name__ == "__main__":
    # args: channels=3, model_width=model_height=32 (must be divisible by 32), s=0.2
    s = 0.2
    Cin = 3
    Cout = sc_ch_dict[s][0]                       # 16
    N, H, W = 2, 32, 32

    key = jax.random.PRNGKey(0)
    kx, k1, k2, k3, k4, k5 = jax.random.split(key, 6)
    x = jax.random.normal(kx, (N, Cin, H, W), jnp.float32)

    params = {
        "conv_w": 0.1 * jax.random.normal(k1, (Cout, Cin, 3, 3), jnp.float32),
        "bn_gamma": 1.0 + 0.1 * jax.random.normal(k2, (Cout,), jnp.float32),
        "bn_beta": 0.1 * jax.random.normal(k3, (Cout,), jnp.float32),
        "bn_mean": 0.1 * jax.random.normal(k4, (Cout,), jnp.float32),
        "bn_var": jnp.abs(1.0 + 0.1 * jax.random.normal(k5, (Cout,), jnp.float32)),
        "prelu_a": jnp.full((Cout,), 0.25, jnp.float32),   # PyTorch PReLU default value
    }

    out = jax.block_until_ready(cnn_model_forward(x, params))
    ref = jax.block_until_ready(reference_forward(x, params))

    assert out.shape == (N, Cout, H // 4, W // 4), out.shape
    # bf16 MXU inputs (K=27 reduction) -> slightly looser tolerance vs f32 HIGHEST ref.
    assert jnp.allclose(out, ref, atol=2e-2, rtol=2e-2), float(jnp.max(jnp.abs(out - ref)))
    print("KERNEL_OK")
</pallas_src>

<mosaic_0001>
module attributes {stable_mosaic.version = 11 : i64} {
  func.func @_fused_cbr_maxpool_kernel(%arg0: i32, %arg1: memref<1x256x32xbf16, #tpu.memory_space<vmem>>, %arg2: memref<32x128xbf16, #tpu.memory_space<vmem>>, %arg3: memref<1x128xf32, #tpu.memory_space<vmem>>, %arg4: memref<1x64x128xf32, #tpu.memory_space<vmem>>) attributes {dimension_semantics = [#tpu.dimension_semantics<parallel>], iteration_bounds = array<i64: 2>, scalar_prefetch = 0 : i64, scratch_operands = 0 : i64, tpu.core_type = #tpu.core_type<tc>, window_params = [{transform_indices = @transform_0, window_bounds = array<i64: 1, 256, 32>}, {pipeline_mode = #tpu.pipeline_mode<synchronous>, transform_indices = @transform_1, window_bounds = array<i64: 32, 128>}, {pipeline_mode = #tpu.pipeline_mode<synchronous>, transform_indices = @transform_2, window_bounds = array<i64: 1, 128>}, {transform_indices = @transform_3, window_bounds = array<i64: 1, 64, 128>}]} {
    %c0 = arith.constant 0 : index
    %c0_0 = arith.constant 0 : index
    %c0_1 = arith.constant 0 : index
    %0 = vector.load %arg1[%c0, %c0_0, %c0_1] : memref<1x256x32xbf16, #tpu.memory_space<vmem>>, vector<1x256x32xbf16>
    %1 = vector.shape_cast %0 : vector<1x256x32xbf16> to vector<256x32xbf16>
    %c0_2 = arith.constant 0 : index
    %c0_3 = arith.constant 0 : index
    %2 = vector.load %arg2[%c0_2, %c0_3] : memref<32x128xbf16, #tpu.memory_space<vmem>>, vector<32x128xbf16>
    %cst = arith.constant dense<0.000000e+00> : vector<256x128xf32>
    %3 = tpu.matmul %1, %2, %cst {dimension_numbers = #tpu.dot_dimension_numbers<[1], [0], [0], [1], [0, 0, 1, 1], [], []>} : vector<256x32xbf16>, vector<32x128xbf16>, vector<256x128xf32> -> vector<256x128xf32>
    %c0_4 = arith.constant 0 : index
    %c0_5 = arith.constant 0 : index
    %4 = vector.load %arg3[%c0_4, %c0_5] : memref<1x128xf32, #tpu.memory_space<vmem>>, vector<1x128xf32>
    %cst_6 = arith.constant 0.000000e+00 : f32
    %5 = vector.broadcast %cst_6 : f32 to vector<256x128xf32>
    %6 = arith.cmpf oge, %3, %5 : vector<256x128xf32>
    %7 = vector.broadcast %4 : vector<1x128xf32> to vector<256x128xf32>
    %8 = arith.mulf %7, %3 : vector<256x128xf32>
    %9 = arith.select %6, %3, %8 : vector<256x128xi1>, vector<256x128xf32>
    %10 = tpu.iota {dimensions = array<i32: 0>} : vector<64x1xi32>
    %11 = vector.extract_strided_slice %9 {offsets = [0, 0], sizes = [64, 128], strides = [1, 1]} : vector<256x128xf32> to vector<64x128xf32>
    %12 = vector.extract_strided_slice %9 {offsets = [64, 0], sizes = [64, 128], strides = [1, 1]} : vector<256x128xf32> to vector<64x128xf32>
    %13 = vector.extract_strided_slice %9 {offsets = [128, 0], sizes = [64, 128], strides = [1, 1]} : vector<256x128xf32> to vector<64x128xf32>
    %14 = vector.extract_strided_slice %9 {offsets = [192, 0], sizes = [64, 128], strides = [1, 1]} : vector<256x128xf32> to vector<64x128xf32>
    %15 = arith.maximumf %11, %12 : vector<64x128xf32>
    %c8_i32 = arith.constant 8 : i32
    %c0_i32 = arith.constant 0 : i32
    %16 = arith.cmpi eq, %c8_i32, %c0_i32 : i32
    %c1_i32 = arith.constant 1 : i32
    %17 = arith.select %16, %c1_i32, %c8_i32 : i32
    %18 = vector.broadcast %17 : i32 to vector<64x1xi32>
    %19 = arith.remsi %10, %18 : vector<64x1xi32>
    %c0_i32_7 = arith.constant 0 : i32
    %20 = vector.broadcast %c0_i32_7 : i32 to vector<64x1xi32>
    %21 = arith.cmpi ne, %19, %20 : vector<64x1xi32>
    %c0_i32_8 = arith.constant 0 : i32
    %22 = vector.broadcast %c0_i32_8 : i32 to vector<64x1xi32>
    %23 = arith.cmpi slt, %19, %22 : vector<64x1xi32>
    %c0_i32_9 = arith.constant 0 : i32
    %24 = arith.cmpi slt, %17, %c0_i32_9 : i32
    %25 = vector.broadcast %24 : i1 to vector<64x1xi1>
    %26 = vector.broadcast %25 : vector<64x1xi1> to vector<64x1xi1>
    %27 = arith.xori %23, %26 : vector<64x1xi1>
    %28 = arith.andi %27, %21 : vector<64x1xi1>
    %29 = vector.broadcast %17 : i32 to vector<64x1xi32>
    %30 = arith.addi %19, %29 : vector<64x1xi32>
    %31 = arith.select %28, %30, %19 : vector<64x1xi1>, vector<64x1xi32>
    %c0_i32_10 = arith.constant 0 : i32
    %32 = vector.broadcast %c0_i32_10 : i32 to vector<64x1xi32>
    %33 = arith.cmpi eq, %31, %32 : vector<64x1xi32>
    %c1_i32_11 = arith.constant 1 : i32
    %34 = tpu.dynamic_rotate %12 by %c1_i32_11 dim 0 : vector<64x128xf32>, i32 -> vector<64x128xf32>
    %cst_12 = arith.constant 0xFF800000 : f32
    %35 = vector.shape_cast %33 : vector<64x1xi1> to vector<64x1xi1>
    %36 = vector.broadcast %35 : vector<64x1xi1> to vector<64x128xi1>
    %37 = vector.broadcast %cst_12 : f32 to vector<64x128xf32>
    %38 = arith.select %36, %37, %34 : vector<64x128xi1>, vector<64x128xf32>
    %39 = arith.maximumf %15, %38 : vector<64x128xf32>
    %40 = arith.maximumf %13, %14 : vector<64x128xf32>
    %c8_i32_13 = arith.constant 8 : i32
    %c0_i32_14 = arith.constant 0 : i32
    %41 = arith.cmpi eq, %c8_i32_13, %c0_i32_14 : i32
    %c1_i32_15 = arith.constant 1 : i32
    %42 = arith.select %41, %c1_i32_15, %c8_i32_13 : i32
    %43 = vector.broadcast %42 : i32 to vector<64x1xi32>
    %44 = arith.remsi %10, %43 : vector<64x1xi32>
    %c0_i32_16 = arith.constant 0 : i32
    %45 = vector.broadcast %c0_i32_16 : i32 to vector<64x1xi32>
    %46 = arith.cmpi ne, %44, %45 : vector<64x1xi32>
    %c0_i32_17 = arith.constant 0 : i32
    %47 = vector.broadcast %c0_i32_17 : i32 to vector<64x1xi32>
    %48 = arith.cmpi slt, %44, %47 : vector<64x1xi32>
    %c0_i32_18 = arith.constant 0 : i32
    %49 = arith.cmpi slt, %42, %c0_i32_18 : i32
    %50 = vector.broadcast %49 : i1 to vector<64x1xi1>
    %51 = vector.broadcast %50 : vector<64x1xi1> to vector<64x1xi1>
    %52 = arith.xori %48, %51 : vector<64x1xi1>
    %53 = arith.andi %52, %46 : vector<64x1xi1>
    %54 = vector.broadcast %42 : i32 to vector<64x1xi32>
    %55 = arith.addi %44, %54 : vector<64x1xi32>
    %56 = arith.select %53, %55, %44 : vector<64x1xi1>, vector<64x1xi32>
    %c0_i32_19 = arith.constant 0 : i32
    %57 = vector.broadcast %c0_i32_19 : i32 to vector<64x1xi32>
    %58 = arith.cmpi eq, %56, %57 : vector<64x1xi32>
    %c1_i32_20 = arith.constant 1 : i32
    %59 = tpu.dynamic_rotate %14 by %c1_i32_20 dim 0 : vector<64x128xf32>, i32 -> vector<64x128xf32>
    %cst_21 = arith.constant 0xFF800000 : f32
    %60 = vector.shape_cast %58 : vector<64x1xi1> to vector<64x1xi1>
    %61 = vector.broadcast %60 : vector<64x1xi1> to vector<64x128xi1>
    %62 = vector.broadcast %cst_21 : f32 to vector<64x128xf32>
    %63 = arith.select %61, %62, %59 : vector<64x128xi1>, vector<64x128xf32>
    %64 = arith.maximumf %40, %63 : vector<64x128xf32>
    %65 = arith.maximumf %39, %64 : vector<64x128xf32>
    %c8_i32_22 = arith.constant 8 : i32
    %66 = vector.broadcast %c8_i32_22 : i32 to vector<64x1xi32>
    %67 = arith.cmpi slt, %10, %66 : vector<64x1xi32>
    %c8_i32_23 = arith.constant 8 : i32
    %68 = tpu.dynamic_rotate %64 by %c8_i32_23 dim 0 : vector<64x128xf32>, i32 -> vector<64x128xf32>
    %cst_24 = arith.constant 0xFF800000 : f32
    %69 = vector.shape_cast %67 : vector<64x1xi1> to vector<64x1xi1>
    %70 = vector.broadcast %69 : vector<64x1xi1> to vector<64x128xi1>
    %71 = vector.broadcast %cst_24 : f32 to vector<64x128xf32>
    %72 = arith.select %70, %71, %68 : vector<64x128xi1>, vector<64x128xf32>
    %73 = arith.maximumf %65, %72 : vector<64x128xf32>
    %c0_25 = arith.constant 0 : index
    %c0_26 = arith.constant 0 : index
    %c0_27 = arith.constant 0 : index
    %74 = vector.load %arg4[%c0_25, %c0_26, %c0_27] : memref<1x64x128xf32, #tpu.memory_space<vmem>>, vector<1x64x128xf32>
    %75 = vector.shape_cast %74 : vector<1x64x128xf32> to vector<64x128xf32>
    %76 = vector.shape_cast %73 : vector<64x128xf32> to vector<1x64x128xf32>
    tpu.vector_store %arg4[%c0_25, %c0_26, %c0_27], %76 {strides = array<i32>} : memref<1x64x128xf32, #tpu.memory_space<vmem>>, vector<1x64x128xf32>,
    return
  }
  func.func @transform_0(%arg0: i32) -> (i32, i32, i32) {
    %c0_i32 = arith.constant 0 : i32
    %c0_i32_0 = arith.constant 0 : i32
    %c0_i32_1 = arith.constant 0 : i32
    return %arg0, %c0_i32, %c0_i32_0 : i32, i32, i32
  }
  func.func @transform_1(%arg0: i32) -> (i32, i32) {
    %c0_i32 = arith.constant 0 : i32
    %c0_i32_0 = arith.constant 0 : i32
    %c0_i32_1 = arith.constant 0 : i32
    return %c0_i32, %c0_i32_0 : i32, i32
  }
  func.func @transform_2(%arg0: i32) -> (i32, i32) {
    %c0_i32 = arith.constant 0 : i32
    %c0_i32_0 = arith.constant 0 : i32
    %c0_i32_1 = arith.constant 0 : i32
    return %c0_i32, %c0_i32_0 : i32, i32
  }
  func.func @transform_3(%arg0: i32) -> (i32, i32, i32) {
    %c0_i32 = arith.constant 0 : i32
    %c0_i32_0 = arith.constant 0 : i32
    %c0_i32_1 = arith.constant 0 : i32
    return %arg0, %c0_i32, %c0_i32_0 : i32, i32, i32
  }
}

</mosaic_0001>

<bundles_post_ra>
// kernel: cnn_model_forward.1
= control target key start
LH: loop header
LB: loop body
LE: loop exit
PB: predicated region body
PF: predicated region fallthrough
CT: control target
= control target key end

     0   :  { %s1021_s12 = smov 0   ;;  %s1297_s0 = inlined_call_operand.vmem [shape: bf16[2,256,32], index: 0, kind: input, shape index: {}]   ;;  %s1298_s1 = inlined_call_operand.vmem [shape: bf16[32,128], index: 1, kind: input, shape index: {}]   ;;  %s1299_s2 = inlined_call_operand.vmem [shape: f32[1,128], index: 2, kind: input, shape index: {}]   ;;  %s1300_s3 = inlined_call_operand.vmem [shape: f32[2,64,128], index: 3, kind: output, shape index: {}]  }
   0x1 LB: > { %s859_s13 = sadd.s32 4294967295, %s999_s12   ;;  %p863_p0 = scmp.ge.s32.totalorder %s999_s12, 1  ;;  %s999_s12 = sphi %s1021_s12, %s13_s12  }
   0x2   : > { %p137_p1 = scmp.lt.s32.totalorder %s999_s12, 3 }
   0x4   : > { %p138_p2 = pnand %p863_p0, %p137_p1 }
   0x5   : > { %p161_p3 = scmp.lt.s32.totalorder (!%p138_p2), %s859_s13, 1 }
   0x6   : > { %141 = sbr.rel (%p138_p2) target bundleno = 222 (0xde), region = 32 }
   0xb   : > { %v977_v0 = vld [vmem:[%s1298_s1 + $0x8] sm:$0xff]  ;;  %v976_v1 = vld [vmem:[%s1298_s1] sm:$0xff]  ;;  %s1318_s13 = smov (!%p161_p3, %s859_s13), 1  ;;  %vm300_vm0 = vcmask 261120   ;;  %v538_v24 = vlaneseq }
   0xc   : > { %355 = vmatpush.bf16.msra.mxu0 %v977_v0  ;;  %978 = vmatpush.bf16.msra.mxu1 %v977_v0  ;;  %s958_s18 = sshll.u32 %s1318_s13, 7  ;;  %v1086_v25 = vld [vmem:[%s1299_s2] ss:$0 sm:$0xff]  ;;  %s959_s24 = sshll.u32 %s1318_s13, 6 }
   0xd   : > { %979 = vmatpush.bf16.msra.mxu2 %v977_v0  ;;  %980 = vmatpush.bf16.msra.mxu3 %v977_v0  ;;  %s1041_s21 = scalar_lea.vmem %s1297_s0, %s958_s18  ;;  %v1088_v26 = vshrl.u32 %v538_v24, 7  ;;  %s1154_s27 = scalar_lea.vmem %s1300_s3, %s959_s24 }
   0xe   : > { %v960_v2 = vld [vmem:[%s1041_s21] sm:$0xff]  ;;  %v961_v6 = vld [vmem:[%s1041_s21 + $0x8] sm:$0xff]  ;;  %v962_v10 = vld [vmem:[%s1041_s21 + $0x10] sm:$0xff] }
   0xf   : > { %v964_v3 = vld [vmem:[%s1041_s21 + $0x20] sm:$0xff]  ;;  %v965_v7 = vld [vmem:[%s1041_s21 + $0x28] sm:$0xff]  ;;  %v966_v11 = vld [vmem:[%s1041_s21 + $0x30] sm:$0xff]  ;;  %v541_v34 = vadd.s32 16, %v1088_v26  ;;  %v540_v36 = vadd.s32 8, %v1088_v26  ;;  %vm667_vm5 = vcmp.lt.s32.totalorder %v1088_v26, 1 }
  0x10   : > { %356 = vmatpush.bf16.msra.mxu0 %v976_v1  ;;  %981 = vmatpush.bf16.msra.mxu1 %v976_v1  ;;  %v968_v4 = vld [vmem:[%s1041_s21 + $0x40] sm:$0xff]  ;;  %v969_v8 = vld [vmem:[%s1041_s21 + $0x48] sm:$0xff]  ;;  %v970_v12 = vld [vmem:[%s1041_s21 + $0x50] sm:$0xff]  ;;  %v542_v48 = vadd.s32 24, %v1088_v26 }
  0x11   : > { %982 = vmatpush.bf16.msra.mxu2 %v976_v1  ;;  %983 = vmatpush.bf16.msra.mxu3 %v976_v1  ;;  %v972_v5 = vld [vmem:[%s1041_s21 + $0x60] sm:$0xff]  ;;  %v973_v9 = vld [vmem:[%s1041_s21 + $0x68] sm:$0xff]  ;;  %v974_v13 = vld [vmem:[%s1041_s21 + $0x70] sm:$0xff]  ;;  %v573_v41 = vand.u32 7, %v541_v34  ;;  %v566_v44 = vand.u32 7, %v540_v36 }
  0x12   : > { %v963_v14 = vld [vmem:[%s1041_s21 + $0x18] sm:$0xff] }
  0x13   : > { %940 = vmatmul.msk.bf16.vlgmr.msra.gmra.mxu0 %vm300_vm0, %v960_v2  ;;  %944 = vmatmul.msk.bf16.vlgmr.msra.gmra.mxu1 %vm300_vm0, %v964_v3  ;;  %v967_v15 = vld [vmem:[%s1041_s21 + $0x38] sm:$0xff]  ;;  %vm1112_vm10 = vcmp.eq.s32.totalorder %v573_v41, 0  ;;  %vm1120_vm12 = vcmp.eq.s32.totalorder %v566_v44, 0 }
  0x14   : > { %948 = vmatmul.msk.bf16.vlgmr.msra.gmra.mxu2 %vm300_vm0, %v968_v4  ;;  %952 = vmatmul.msk.bf16.vlgmr.msra.gmra.mxu3 %vm300_vm0, %v972_v5  ;;  %v971_v16 = vld [vmem:[%s1041_s21 + $0x58] sm:$0xff]  ;;  %v580_v5 = vand.u32 7, %v542_v48 }
  0x15   : > { %v975_v17 = vld [vmem:[%s1041_s21 + $0x78] sm:$0xff] }
  0x16   : > { %vm1142_vm15 = vcmp.eq.s32.totalorder %v580_v5, 0 }
  0x23   : > { %941 = vmatmul.msk.bf16.gmra.mxu0 %vm300_vm0, %v961_v6  ;;  %945 = vmatmul.msk.bf16.gmra.mxu1 %vm300_vm0, %v965_v7  ;;  %v543_v6 = vadd.s32 32, %v1088_v26 }
  0x24   : > { %949 = vmatmul.msk.bf16.gmra.mxu2 %vm300_vm0, %v969_v8  ;;  %953 = vmatmul.msk.bf16.gmra.mxu3 %vm300_vm0, %v973_v9 }
  0x33   : > { %942 = vmatmul.msk.bf16.gmra.mxu0 %vm300_vm0, %v962_v10  ;;  %946 = vmatmul.msk.bf16.gmra.mxu1 %vm300_vm0, %v966_v11 }
  0x34   : > { %950 = vmatmul.msk.bf16.gmra.mxu2 %vm300_vm0, %v970_v12  ;;  %954 = vmatmul.msk.bf16.gmra.mxu3 %vm300_vm0, %v974_v13 }
  0x43   : > { %943 = vmatmul.msk.bf16.gmra.mxu0 %vm300_vm0, %v963_v14  ;;  %947 = vmatmul.msk.bf16.gmra.mxu1 %vm300_vm0, %v967_v15 }
  0x44   : > { %951 = vmatmul.msk.bf16.gmra.mxu2 %vm300_vm0, %v971_v16  ;;  %955 = vmatmul.msk.bf16.gmra.mxu3 %vm300_vm0, %v975_v17 }
  0x90   : > { %v1075_v18 = vpop.f32.mrf.mxu0  ;;  %v1077_v19 = vpop.f32.mrf.mxu1 }
  0x97   : > { %v1079_v20 = vpop.f32.mrf.mxu2  ;;  %v418_v21 = vpop.f32.mrf.mxu3 }
  0x98   : > { %v1081_v22 = vpop.f32.mrf.mxu0  ;;  %v380_v23 = vpop.f32.mrf.mxu1  ;;  %v498_v35 = vmul.f32 %v1086_v25, %v418_v21  ;;  %vm463_vm4 = vcmp.ge.f32.partialorder %v418_v21, 0.0 }
  0x99   : > { %v483_v29 = vmul.f32 %v1086_v25, %v380_v23  ;;  %vm448_vm1 = vcmp.ge.f32.partialorder %v380_v23, 0.0 }
  0x9a   : > { %v1103_v43 = vsel %vm463_vm4, %v418_v21, %v498_v35 }
  0x9b   : > { %v1096_v37 = vsel %vm448_vm1, %v380_v23, %v483_v29  ;;  %v716_v56 = vrot.slane %v1103_v43, 7 }
  0x9c   : > { %v660_v45 = vrot.slane %v1096_v37, 7 }
  0x9f   : > { %v400_v27 = vpop.f32.mrf.mxu2  ;;  %v420_v28 = vpop.f32.mrf.mxu3 }
  0xa0   : > { %v363_v30 = vpop.f32.mrf.mxu0  ;;  %v383_v31 = vpop.f32.mrf.mxu1  ;;  %v499_v32 = vmul.f32 %v1086_v25, %v420_v28  ;;  %vm464_vm3 = vcmp.ge.f32.partialorder %v420_v28, 0.0  ;;  %v491_v49 = vmul.f32 %v1086_v25, %v400_v27  ;;  %vm456_vm8 = vcmp.ge.f32.partialorder %v400_v27, 0.0 }
  0xa1   : > { %vm449_vm2 = vcmp.ge.f32.partialorder %v383_v31, 0.0  ;;  %v484_v33 = vmul.f32 %v1086_v25, %v383_v31  ;;  %v476_v40 = vmul.f32 %v1086_v25, %v363_v30  ;;  %vm441_vm6 = vcmp.ge.f32.partialorder %v363_v30, 0.0 }
  0xa2   : > { %v531_v39 = vsel %vm464_vm3, %v420_v28, %v499_v32  ;;  %v523_v63 = vsel %vm456_vm8, %v400_v27, %v491_v49 }
  0xa3   : > { %v1098_v38 = vsel %vm449_vm2, %v383_v31, %v484_v33  ;;  %v717_v50 = vrot.slane %v531_v39, 7  ;;  %v508_v54 = vsel %vm441_vm6, %v363_v30, %v476_v40  ;;  %v709_v11 = vmax.f32 %v523_v63, %v531_v39 }
  0xa4   : > { %v661_v42 = vrot.slane %v1098_v38, 7  ;;  %v549_v1 = vmax.f32 %v508_v54, %v1098_v38  ;;  %v587_v39 = vand.u32 7, %v543_v6  ;;  %v475_v63 = vmul.f32 %v1086_v25, %v1081_v22 }
  0xa5   : > { %v730_v0 = vsel %vm667_vm5, %v716_v56, %v717_v50 }
  0xa6   : > { %v673_v58 = vsel %vm667_vm5, %v660_v45, %v661_v42  ;;  %v733_v12 = vsel %vm1120_vm12, -inf, %v730_v0  ;;  %vm1169_vm6 = vcmp.eq.s32.totalorder %v587_v39, 0 }
  0xa7   : > { %v403_v46 = vpop.f32.mrf.mxu2  ;;  %v423_v47 = vpop.f32.mrf.mxu3  ;;  %v694_v3 = vsel %vm1112_vm10, -inf, %v673_v58  ;;  %v1147_v29 = vmax.f32 %v709_v11, %v733_v12 }
  0xa8   : > { %vm457_vm7 = vcmp.ge.f32.partialorder %v403_v46, 0.0  ;;  %v492_v51 = vmul.f32 %v1086_v25, %v403_v46  ;;  %v365_v52 = vpop.f32.mrf.mxu0  ;;  %v385_v53 = vpop.f32.mrf.mxu1  ;;  %vm465_vm9 = vcmp.ge.f32.partialorder %v423_v47, 0.0  ;;  %v500_v55 = vmul.f32 %v1086_v25, %v423_v47 }
  0xa9   : > { %vm450_vm11 = vcmp.ge.f32.partialorder %v385_v53, 0.0  ;;  %v485_v62 = vmul.f32 %v1086_v25, %v385_v53  ;;  %v477_v9 = vmul.f32 %v1086_v25, %v365_v52  ;;  %vm442_vm13 = vcmp.ge.f32.partialorder %v365_v52, 0.0 }
  0xaa   : > { %v524_v60 = vsel %vm457_vm7, %v403_v46, %v492_v51  ;;  %v532_v61 = vsel %vm465_vm9, %v423_v47, %v500_v55  ;;  %v702_v16 = vmax.f32 %v549_v1, %v694_v3 }
  0xab   : > { %v718_v2 = vrot.slane %v532_v61, 7  ;;  %v517_v4 = vsel %vm450_vm11, %v385_v53, %v485_v62  ;;  %v710_v7 = vmax.f32 %v524_v60, %v532_v61  ;;  %v509_v31 = vsel %vm442_vm13, %v365_v52, %v477_v9 }
  0xac   : > { %v662_v10 = vrot.slane %v517_v4, 7  ;;  %v550_v40 = vmax.f32 %v509_v31, %v517_v4  ;;  %v544_v61 = vadd.s32 40, %v1088_v26  ;;  %vm439_vm13 = vcmp.ge.f32.partialorder %v1075_v18, 0.0 }
  0xad   : > { %v729_v8 = vsel %vm667_vm5, %v717_v50, %v718_v2 }
  0xae   : > { %v734_v13 = vsel %vm1112_vm10, -inf, %v729_v8  ;;  %v672_v32 = vsel %vm667_vm5, %v661_v42, %v662_v10  ;;  %v594_v9 = vand.u32 7, %v544_v61  ;;  %vm447_vm10 = vcmp.ge.f32.partialorder %v1077_v19, 0.0 }
  0xaf   : > { %v405_v14 = vpop.f32.mrf.mxu2  ;;  %v425_v15 = vpop.f32.mrf.mxu3  ;;  %v742_v17 = vmax.f32 %v710_v7, %v734_v13  ;;  %v695_v41 = vsel %vm1142_vm15, -inf, %v672_v32 }
  0xb0   : > { %vm458_vm14 = vcmp.ge.f32.partialorder %v405_v14, 0.0  ;;  %v493_v21 = vmul.f32 %v1086_v25, %v405_v14  ;;  %v368_v23 = vpop.f32.mrf.mxu0  ;;  %v388_v24 = vpop.f32.mrf.mxu1  ;;  %vm466_vm0 = vcmp.ge.f32.partialorder %v425_v15, 0.0  ;;  %v501_v28 = vmul.f32 %v1086_v25, %v425_v15 }
  0xb1   : > { %v750_v30 = vmax.f32 %v702_v16, %v742_v17  ;;  %vm451_vm1 = vcmp.ge.f32.partialorder %v388_v24, 0.0  ;;  %v486_v35 = vmul.f32 %v1086_v25, %v388_v24  ;;  %v478_v42 = vmul.f32 %v1086_v25, %v368_v23 }
  0xb2   : > { %v525_v33 = vsel %vm458_vm14, %v405_v14, %v493_v21  ;;  %v533_v34 = vsel %vm466_vm0, %v425_v15, %v501_v28  ;;  %vm443_vm2 = vcmp.ge.f32.partialorder %v368_v23, 0.0  ;;  %v703_v52 = vmax.f32 %v550_v40, %v695_v41 }
  0xb3   : > { %v790_v36 = vmax.f32 %v750_v30, %v1147_v29  ;;  %v719_v38 = vrot.slane %v533_v34, 7  ;;  %v518_v44 = vsel %vm451_vm1, %v388_v24, %v486_v35  ;;  %v711_v46 = vmax.f32 %v525_v33, %v533_v34 }
  0xb4   : > { %v663_v48 = vrot.slane %v518_v44, 7  ;;  %v510_v57 = vsel %vm443_vm2, %v368_v23, %v478_v42  ;;  %v482_v14 = vmul.f32 %v1086_v25, %v1077_v19  ;;  %v545_v21 = vadd.s32 48, %v1088_v26 }
  0xb5   : > { %798 = vst [vmem:[%s1154_s27 + $0x10] sm:$0xff] %v790_v36  ;;  %v728_v47 = vsel %vm667_vm5, %v718_v2, %v719_v38  ;;  %v551_v5 = vmax.f32 %v510_v57, %v518_v44  ;;  %vm1194_vm14 = vcmp.eq.s32.totalorder %v594_v9, 0  ;;  %vm440_vm1 = vcmp.ge.f32.partialorder %v1081_v22, 0.0 }
  0xb6   : > { %v735_v49 = vsel %vm1142_vm15, -inf, %v728_v47  ;;  %v671_v0 = vsel %vm667_vm5, %v662_v10, %v663_v48  ;;  %v1202_v40 = vsel %vm447_vm10, %v1077_v19, %v482_v14  ;;  %v601_v44 = vand.u32 7, %v545_v21 }
  0xb7   : > { %v408_v50 = vpop.f32.mrf.mxu2  ;;  %v428_v51 = vpop.f32.mrf.mxu3  ;;  %v743_v53 = vmax.f32 %v711_v46, %v735_v49  ;;  %v696_v7 = vsel %vm1169_vm6, -inf, %v671_v0  ;;  %v490_v9 = vmul.f32 %v1086_v25, %v1079_v20 }
  0xb8   : > { %vm459_vm3 = vcmp.ge.f32.partialorder %v408_v50, 0.0  ;;  %v494_v54 = vmul.f32 %v1086_v25, %v408_v50  ;;  %v390_v55 = vpop.f32.mrf.mxu1  ;;  %vm467_vm4 = vcmp.ge.f32.partialorder %v428_v51, 0.0  ;;  %v502_v58 = vmul.f32 %v1086_v25, %v428_v51  ;;  %v370_v60 = vpop.f32.mrf.mxu0 }
  0xb9   : > { %v751_v62 = vmax.f32 %v703_v52, %v743_v53  ;;  %vm452_vm7 = vcmp.ge.f32.partialorder %v390_v55, 0.0  ;;  %v487_v3 = vmul.f32 %v1086_v25, %v390_v55  ;;  %v479_v10 = vmul.f32 %v1086_v25, %v370_v60 }
  0xba   : > { %v526_v1 = vsel %vm459_vm3, %v408_v50, %v494_v54  ;;  %v534_v2 = vsel %vm467_vm4, %v428_v51, %v502_v58  ;;  %vm444_vm8 = vcmp.ge.f32.partialorder %v370_v60, 0.0  ;;  %v704_v23 = vmax.f32 %v551_v5, %v696_v7 }
  0xbb   : > { %v791_v4 = vmax.f32 %v751_v62, %v742_v17  ;;  %v720_v6 = vrot.slane %v534_v2, 7  ;;  %v1178_v8 = vsel %vm452_vm7, %v390_v55, %v487_v3  ;;  %v712_v11 = vmax.f32 %v526_v1, %v534_v2 }
  0xbc   : > { %v664_v13 = vrot.slane %v1178_v8, 7  ;;  %v511_v32 = vsel %vm444_vm8, %v370_v60, %v479_v10  ;;  %v474_v52 = vmul.f32 %v1086_v25, %v1075_v18  ;;  %vm1224_vm4 = vcmp.eq.s32.totalorder %v601_v44, 0 }
  0xbd   : > { %799 = vst [vmem:[%s1154_s27 + $0x18] sm:$0xff] %v791_v4  ;;  %v727_v12 = vsel %vm667_vm5, %v719_v38, %v720_v6  ;;  %v552_v46 = vmax.f32 %v511_v32, %v1178_v8  ;;  %v546_v5 = vadd.s32 56, %v1088_v26  ;;  %vm455_vm7 = vcmp.ge.f32.partialorder %v1079_v20, 0.0 }
  0xbe   : > { %v736_v15 = vsel %vm1169_vm6, -inf, %v727_v12  ;;  %v670_v34 = vsel %vm667_vm5, %v663_v48, %v664_v13  ;;  %v506_v14 = vsel %vm439_vm13, %v1075_v18, %v474_v52 }
  0xbf   : > { %v410_v16 = vpop.f32.mrf.mxu2  ;;  %v430_v17 = vpop.f32.mrf.mxu3  ;;  %v744_v24 = vmax.f32 %v712_v11, %v736_v15  ;;  %v697_v47 = vsel %vm1194_vm14, -inf, %v670_v34 }
  0xc0   : > { %vm460_vm9 = vcmp.ge.f32.partialorder %v410_v16, 0.0  ;;  %v495_v27 = vmul.f32 %v1086_v25, %v410_v16  ;;  %v393_v28 = vpop.f32.mrf.mxu1  ;;  %vm468_vm11 = vcmp.ge.f32.partialorder %v430_v17, 0.0  ;;  %v503_v30 = vmul.f32 %v1086_v25, %v430_v17  ;;  %v373_v38 = vpop.f32.mrf.mxu0 }
  0xc1   : > { %v752_v31 = vmax.f32 %v704_v23, %v744_v24  ;;  %vm453_vm15 = vcmp.ge.f32.partialorder %v393_v28, 0.0  ;;  %v488_v39 = vmul.f32 %v1086_v25, %v393_v28  ;;  %v480_v49 = vmul.f32 %v1086_v25, %v373_v38 }
  0xc2   : > { %v527_v35 = vsel %vm460_vm9, %v410_v16, %v495_v27  ;;  %v535_v36 = vsel %vm468_vm11, %v430_v17, %v503_v30  ;;  %vm445_vm0 = vcmp.ge.f32.partialorder %v373_v38, 0.0  ;;  %v705_v58 = vmax.f32 %v552_v46, %v697_v47 }
  0xc3   : > { %v792_v41 = vmax.f32 %v752_v31, %v743_v53  ;;  %v721_v42 = vrot.slane %v535_v36, 7  ;;  %v1208_v48 = vsel %vm453_vm15, %v393_v28, %v488_v39  ;;  %v713_v50 = vmax.f32 %v527_v35, %v535_v36 }
  0xc4   : > { %v665_v19 = vrot.slane %v1208_v48, 7  ;;  %v659_v53 = vrot.slane %v1202_v40, 7  ;;  %v512_v0 = vsel %vm445_vm0, %v373_v38, %v480_v49  ;;  %v507_v17 = vsel %vm440_vm1, %v1081_v22, %v475_v63 }
  0xc5   : > { %800 = vst [vmem:[%s1154_s27 + $0x20] sm:$0xff] %v792_v41  ;;  %v726_v51 = vsel %vm667_vm5, %v720_v6, %v721_v42  ;;  %v553_v12 = vmax.f32 %v512_v0, %v1208_v48  ;;  %v559_v27 = vand.u32 7, %v1088_v26  ;;  %v608_v28 = vand.u32 7, %v546_v5 }
  0xc6   : > { %v737_v54 = vsel %vm1194_vm14, -inf, %v726_v51  ;;  %v669_v4 = vsel %vm667_vm5, %v664_v13, %v665_v19  ;;  %v674_v21 = vsel %vm667_vm5, %v659_v53, %v660_v45  ;;  %v522_v22 = vsel %vm455_vm7, %v1079_v20, %v490_v9 }
  0xc7   : > { %v413_v55 = vpop.f32.mrf.mxu2  ;;  %v433_v57 = vpop.f32.mrf.mxu3  ;;  %v745_v60 = vmax.f32 %v713_v50, %v737_v54  ;;  %v698_v13 = vsel %vm1224_vm4, -inf, %v669_v4  ;;  %v548_v36 = vmax.f32 %v507_v17, %v1096_v37  ;;  %v693_v38 = vsel %vm1120_vm12, -inf, %v674_v21 }
  0xc8   : > { %vm461_vm2 = vcmp.ge.f32.partialorder %v413_v55, 0.0  ;;  %v496_v61 = vmul.f32 %v1086_v25, %v413_v55  ;;  %v395_v62 = vpop.f32.mrf.mxu1  ;;  %vm469_vm3 = vcmp.ge.f32.partialorder %v433_v57, 0.0  ;;  %v504_v1 = vmul.f32 %v1086_v25, %v433_v57  ;;  %v375_v15 = vpop.f32.mrf.mxu0 }
  0xc9   : > { %v753_v2 = vmax.f32 %v705_v58, %v745_v60  ;;  %vm454_vm6 = vcmp.ge.f32.partialorder %v395_v62, 0.0  ;;  %v489_v8 = vmul.f32 %v1086_v25, %v395_v62  ;;  %v706_v33 = vmax.f32 %v553_v12, %v698_v13 }
  0xca   : > { %v528_v6 = vsel %vm461_vm2, %v413_v55, %v496_v61  ;;  %v536_v7 = vsel %vm469_vm3, %v433_v57, %v504_v1  ;;  %v481_v45 = vmul.f32 %v1086_v25, %v375_v15  ;;  %vm446_vm8 = vcmp.ge.f32.partialorder %v375_v15, 0.0 }
  0xcb   : > { %v793_v11 = vmax.f32 %v753_v2, %v744_v24  ;;  %v722_v10 = vrot.slane %v536_v7, 7  ;;  %v521_v16 = vsel %vm454_vm6, %v395_v62, %v489_v8  ;;  %v714_v23 = vmax.f32 %v528_v6, %v536_v7 }
  0xcc   : > { %v666_v30 = vrot.slane %v521_v16, 7  ;;  %vm1261_vm11 = vcmp.eq.s32.totalorder %v559_v27, 0  ;;  %vm1265_vm13 = vcmp.eq.s32.totalorder %v608_v28, 0  ;;  %v513_v46 = vsel %vm446_vm8, %v375_v15, %v481_v45 }
  0xcd   : > { %801 = vst [vmem:[%s1154_s27 + $0x28] sm:$0xff] %v793_v11  ;;  %v725_v18 = vsel %vm667_vm5, %v721_v42, %v722_v10  ;;  %v708_v50 = vmax.f32 %v522_v22, %v1103_v43  ;;  %v701_v51 = vmax.f32 %v548_v36, %v693_v38  ;;  %v554_v54 = vmax.f32 %v513_v46, %v521_v16 }
  0xce   : > { %v738_v24 = vsel %vm1224_vm4, -inf, %v725_v18  ;;  %v668_v44 = vsel %vm667_vm5, %v665_v19, %v666_v30  ;;  %v675_v37 = vsel %vm667_vm5, %v666_v30, %v659_v53 }
  0xcf   : > { %v415_v31 = vpop.f32.mrf.mxu2  ;;  %v435_v32 = vpop.f32.mrf.mxu3  ;;  %v746_v34 = vmax.f32 %v714_v23, %v738_v24  ;;  %v692_v52 = vsel %vm1261_vm11, -inf, %v675_v37  ;;  %v699_v19 = vsel %vm1265_vm13, -inf, %v668_v44  ;;  %v749_v57 = vmax.f32 %v701_v51, %v1147_v29 }
  0xd0   : > { %vm462_vm9 = vcmp.ge.f32.partialorder %v415_v31, 0.0  ;;  %v497_v35 = vmul.f32 %v1086_v25, %v415_v31  ;;  %vm470_vm10 = vcmp.ge.f32.partialorder %v435_v32, 0.0  ;;  %v505_v41 = vmul.f32 %v1086_v25, %v435_v32 }
  0xd1   : > { %v754_v39 = vmax.f32 %v706_v33, %v746_v34  ;;  %v547_v25 = vmax.f32 %v506_v14, %v1202_v40  ;;  %v707_v62 = vmax.f32 %v554_v54, %v699_v19 }
  0xd2   : > { %v529_v47 = vsel %vm462_vm9, %v415_v31, %v497_v35  ;;  %v537_v49 = vsel %vm470_vm10, %v435_v32, %v505_v41 }
  0xd3   : > { %v794_v59 = vmax.f32 %v754_v39, %v745_v60  ;;  %v723_v48 = vrot.slane %v537_v49, 7  ;;  %v715_v53 = vmax.f32 %v529_v47, %v537_v49  ;;  %v700_v61 = vmax.f32 %v547_v25, %v692_v52 }
  0xd5   : > { %802 = vst [vmem:[%s1154_s27 + $0x30] sm:$0xff] %v794_v59  ;;  %v724_v55 = vsel %vm667_vm5, %v722_v10, %v723_v48  ;;  %v731_v40 = vsel %vm667_vm5, %v723_v48, %v716_v56 }
  0xd6   : > { %v732_v58 = vsel %vm1261_vm11, -inf, %v731_v40  ;;  %v739_v60 = vsel %vm1265_vm13, -inf, %v724_v55 }
  0xd7   : > { %v740_v63 = vmax.f32 %v708_v50, %v732_v58  ;;  %v747_v0 = vmax.f32 %v715_v53, %v739_v60 }
  0xd9   : > { %v748_v1 = vmax.f32 %v700_v61, %v740_v63  ;;  %v755_v2 = vmax.f32 %v707_v62, %v747_v0  ;;  %v789_v3 = vmax.f32 %v749_v57, %v740_v63 }
  0xdb   : > { %v795_v4 = vmax.f32 %v755_v2, %v746_v34  ;;  %796 = vst [vmem:[%s1154_s27] sm:$0xff] %v748_v1 }
  0xdc   : > { %797 = vst [vmem:[%s1154_s27 + $0x8] sm:$0xff] %v789_v3 }
  0xdd   : > { %803 = vst [vmem:[%s1154_s27 + $0x38] sm:$0xff] %v795_v4 }
  0xde PF: > { %s13_s12 = sadd.s32 1, %s999_s12  }
  0xdf   : > { %p10_p4 = scmp.ge.s32.totalorder %s13_s12, 4  }
  0xe1   :  { %12 = sbr.rel (!%p10_p4) target bundleno = 1 (0x1), region = 62 }

</bundles_post_ra>
